<compile_context>
chip_gen: v7x
topology: tpu7x:2x2x1
jax: 0.10.0
libtpu: 0.0.40
codegen_flags: <defaults>
</compile_context>

<pallas_src>
import functools

import jax
import jax.numpy as jnp
from jax.experimental import pallas as pl
from jax.experimental.pallas import tpu as pltpu


def _cbt_kernel(x_ref, g_ref, bln_ref, wqkv_ref, wout_ref, bout_ref,
                o_ref, acc_ref, *, heads, dim_head, block_b, seq_len):
    """One (batch_block, layer) grid step: LayerNorm -> MHA -> out proj -> residual.

    Ref shapes:
      x_ref    : (block_b, N, D)        input rows (read at layer 0 only)
      g_ref    : (1, D, 1)              LayerNorm gamma (column vector)
      bln_ref  : (1, D, 1)              LayerNorm beta
      wqkv_ref : (1, 3*inner, D)        qkv weight, transposed; q rows pre-scaled
      wout_ref : (1, D, inner)          out-proj weight, transposed
      bout_ref : (1, D, 1)              out-proj bias
      o_ref    : (block_b, N, D)        output rows (written at last layer only)
      acc_ref  : (D, block_b*N) f32     persistent residual stream (feature-major)
    """
    layer = pl.program_id(1)
    n_layers = pl.num_programs(1)
    n = seq_len
    t = block_b * n
    inner = heads * dim_head
    d = x_ref.shape[-1]

    @pl.when(layer == 0)
    def _():
        # (block_b, N, D) -> (T, D) -> (D, T); one transpose per batch block.
        x0 = x_ref[...].reshape(t, d).astype(jnp.float32)
        acc_ref[...] = x0.T

    x = acc_ref[...]                                    # (D, T) f32 residual stream

    # ---- LayerNorm over features (axis 0), two-pass (centered) stats in f32 ----
    mean = jnp.mean(x, axis=0, keepdims=True)           # (1, T)
    xc = x - mean
    var = jnp.mean(xc * xc, axis=0, keepdims=True)      # (1, T)
    g = g_ref[0].astype(jnp.float32)                    # (D, 1)
    be = bln_ref[0].astype(jnp.float32)                 # (D, 1)
    xn = xc * jax.lax.rsqrt(var + 1e-5) * g + be        # (D, T) f32

    cdt = wqkv_ref.dtype                                # native compute dtype
    xn_c = xn.astype(cdt)

    # ---- QKV projection: one canonical (3*inner, D) @ (D, T) matmul ----
    # (softmax scale already folded into the q rows of the weight host-side)
    qkv = jax.lax.dot_general(
        wqkv_ref[0], xn_c,
        dimension_numbers=(((1,), (0,)), ((), ())),
        preferred_element_type=jnp.float32)             # (3*inner, T) f32
    qkv_c = qkv.astype(cdt)                             # single cast of q/k/v

    wout_t = wout_ref[0]                                # (D, inner)
    bias = bout_ref[0].astype(jnp.float32)              # (D, 1)

    outs = []
    for b in range(block_b):                            # unrolled, block_b is static
        blk = qkv_c[:, b * n:(b + 1) * n]               # (3*inner, N)
        blk = blk.reshape(3, heads, dim_head, n)        # leading-dim split only
        q = blk[0]                                      # (H, dh, N), already scaled
        k = blk[1]                                      # (H, dh, N)
        v = blk[2]                                      # (H, dh, N)

        # scores: (H, N, dh) @ (H, dh, N) -> (H, N, N)  (canonical batched matmul)
        q_t = jnp.swapaxes(q, 1, 2)                     # small per-row transpose
        s = jax.lax.dot_general(
            q_t, k,
            dimension_numbers=(((2,), (1,)), ((0,), (0,))),
            preferred_element_type=jnp.float32)         # (H, N, N) f32

        m = jnp.max(s, axis=-1, keepdims=True)
        p = jnp.exp(s - m)                              # unnormalized probs
        l = jnp.sum(p, axis=-1)                         # (H, N)
        p_c = p.astype(cdt)                             # single pass over p

        # PV: (H, dh, Nk) x (H, Nq, Nk) -> (H, dh, Nq)  (documented batched-NT form)
        ov = jax.lax.dot_general(
            v, p_c,
            dimension_numbers=(((2,), (2,)), ((0,), (0,))),
            preferred_element_type=jnp.float32)         # (H, dh, N) f32
        # normalize AFTER PV: H*dh*N multiplies instead of H*N*N
        ov = ov * pl.reciprocal(l, approx=True)[:, None, :]

        # out projection: heads merge is a free leading reshape, then one K=inner matmul
        ov2 = ov.astype(cdt).reshape(inner, n)          # (inner, N)
        out_b = jax.lax.dot_general(
            wout_t, ov2,
            dimension_numbers=(((1,), (0,)), ((), ())),
            preferred_element_type=jnp.float32)         # (D, N) f32
        outs.append(out_b)

    out_all = outs[0] if block_b == 1 else jnp.concatenate(outs, axis=1)  # (D, T)

    # ---- residual ----
    acc_ref[...] = x + out_all + bias

    @pl.when(layer == n_layers - 1)
    def _():
        y = acc_ref[...]                                # (D, T)
        o_ref[...] = y.T.reshape(block_b, n, d).astype(o_ref.dtype)


def _choose_block_b(B, N, D, inner, heads, budget_bytes=8 * 1024 * 1024):
    """Largest divisor of B whose per-step working set fits a modest VMEM budget."""
    best = 1
    for bb in range(1, B + 1):
        if B % bb:
            continue
        t = bb * N
        est = (D * t) * 4 * 4                      # residual + LN/out transients (f32)
        est += (3 * inner * t) * 8                 # qkv f32 + compute-dtype copy
        est += heads * N * N * 4 * 3               # scores / probs transients (per row)
        est += bb * N * D * 4 * 4                  # x / o blocks (double-buffered)
        if est <= budget_bytes:
            best = bb
    return best


def _vmem_limit_bytes(block_b, N, D, inner, heads, act_dtype, param_dtype):
    """Sized VMEM limit (not hardcoded); capped at 48 MiB so it is v7x-safe."""
    af = jnp.dtype(act_dtype).itemsize
    pf = jnp.dtype(param_dtype).itemsize
    t = block_b * N
    need = 2 * (2 * block_b * N * D * af)                          # x + o, double-buffered
    need += 2 * (3 * inner * D + D * inner + 3 * D) * pf           # weights, double-buffered
    need += D * t * 4                                              # residual scratch
    need += (3 * inner * t) * (4 + pf)                             # qkv (f32 + cdt)
    need += heads * N * N * 4 * 3                                  # scores/probs
    need += (D * t) * 4 * 3                                        # xn / out / x values
    return int(min(max(2 * need, 32 * 1024 * 1024), 48 * 1024 * 1024))


def cbt_forward(x, params, *, heads, dim_head, block_b=None):
    """Full CBT forward: x (B, N, D) -> (B, N, D), all layers fused in one kernel."""
    B, N, D = x.shape
    inner = heads * dim_head
    depth = len(params)
    scale = float(dim_head) ** -0.5

    if block_b is None:
        block_b = _choose_block_b(B, N, D, inner, heads)
    assert B % block_b == 0

    # Host-side (one-time, outside-kernel) parameter rearrangement.
    def _prep_qkv(w):                       # w: (D, 3*inner); scale the q columns
        w = jnp.concatenate([w[:, :inner] * scale, w[:, inner:]], axis=1)
        return w.T                          # (3*inner, D)

    w_qkv_t = jnp.stack([_prep_qkv(p["w_qkv"]) for p in params])      # (depth, 3I, D)
    w_out_t = jnp.stack([p["w_out"].T for p in params])               # (depth, D, I)
    gamma = jnp.stack([p["gamma"].reshape(D, 1) for p in params])     # (depth, D, 1)
    beta = jnp.stack([p["beta"].reshape(D, 1) for p in params])       # (depth, D, 1)
    b_out = jnp.stack([p["b_out"].reshape(D, 1) for p in params])     # (depth, D, 1)

    kernel = functools.partial(_cbt_kernel, heads=heads, dim_head=dim_head,
                               block_b=block_b, seq_len=N)

    vmem_limit = _vmem_limit_bytes(block_b, N, D, inner, heads,
                                   x.dtype, w_qkv_t.dtype)

    return pl.pallas_call(
        kernel,
        out_shape=jax.ShapeDtypeStruct((B, N, D), x.dtype),
        grid_spec=pltpu.PrefetchScalarGridSpec(
            num_scalar_prefetch=0,
            grid=(B // block_b, depth),                 # depth innermost ("arbitrary")
            in_specs=[
                pl.BlockSpec((block_b, N, D), lambda bi, li: (bi, 0, 0)),   # x
                pl.BlockSpec((1, D, 1), lambda bi, li: (li, 0, 0)),         # ln gamma
                pl.BlockSpec((1, D, 1), lambda bi, li: (li, 0, 0)),         # ln beta
                pl.BlockSpec((1, 3 * inner, D), lambda bi, li: (li, 0, 0)), # qkv weight^T
                pl.BlockSpec((1, D, inner), lambda bi, li: (li, 0, 0)),     # out weight^T
                pl.BlockSpec((1, D, 1), lambda bi, li: (li, 0, 0)),         # out bias
            ],
            out_specs=pl.BlockSpec((block_b, N, D), lambda bi, li: (bi, 0, 0)),
            scratch_shapes=[pltpu.VMEM((D, block_b * N), jnp.float32)],     # residual
        ),
        compiler_params=pltpu.CompilerParams(
            dimension_semantics=("parallel", "arbitrary"),
            vmem_limit_bytes=vmem_limit,
        ),
    )(x, gamma, beta, w_qkv_t, w_out_t, b_out)


def init_cbt_params(key, dim, depth, heads, dim_head):
    """Deterministic synthetic parameters for `depth` layers."""
    inner = heads * dim_head
    params = []
    for _ in range(depth):
        k1, k2, k3, k4, k5, key = jax.random.split(key, 6)
        params.append(dict(
            gamma=1.0 + 0.1 * jax.random.normal(k4, (dim,), jnp.float32),
            beta=0.1 * jax.random.normal(k5, (dim,), jnp.float32),
            w_qkv=(jax.random.normal(k1, (dim, 3 * inner), jnp.float32)
                   * (1.0 / jnp.sqrt(dim))),
            w_out=(jax.random.normal(k2, (inner, dim), jnp.float32)
                   * (1.0 / jnp.sqrt(inner))),
            b_out=0.02 * jax.random.normal(k3, (dim,), jnp.float32),
        ))
    return params


# ---------- pure-JAX reference (sanity check) ----------
def _ref_layer(x, p, heads, dim_head):
    mean = jnp.mean(x, axis=-1, keepdims=True)
    var = jnp.mean((x - mean) ** 2, axis=-1, keepdims=True)
    xn = (x - mean) / jnp.sqrt(var + 1e-5) * p["gamma"] + p["beta"]
    qkv = xn @ p["w_qkv"]
    inner = heads * dim_head
    q, k, v = jnp.split(qkv, 3, axis=-1)
    B, N, _ = x.shape
    reshape = lambda t: t.reshape(B, N, heads, dim_head).transpose(0, 2, 1, 3)
    q, k, v = reshape(q), reshape(k), reshape(v)
    dots = jnp.einsum("bhid,bhjd->bhij", q, k) * (dim_head ** -0.5)
    attn = jax.nn.softmax(dots, axis=-1)
    out = jnp.einsum("bhij,bhjd->bhid", attn, v)
    out = out.transpose(0, 2, 1, 3).reshape(B, N, inner)
    out = out @ p["w_out"] + p["b_out"]
    return out + x


def cbt_ref(x, params, heads, dim_head):
    for p in params:
        x = _ref_layer(x, p, heads, dim_head)
    return x


if __name__ == "__main__":
    B, N, DIM = 2, 8, 32
    DEPTH, HEADS, DIM_HEAD = 2, 4, 8

    key = jax.random.PRNGKey(0)
    kx, kp = jax.random.split(key)
    x = jax.random.normal(kx, (B, N, DIM), jnp.float32)
    params = init_cbt_params(kp, DIM, DEPTH, HEADS, DIM_HEAD)

    out = cbt_forward(x, params, heads=HEADS, dim_head=DIM_HEAD)
    out = jax.block_until_ready(out)

    ref = cbt_ref(x, params, HEADS, DIM_HEAD)
    assert out.shape == (B, N, DIM)
    # approx (EUP) reciprocal in the softmax denominator compounds over depth ->
    # slightly loosened tolerance.
    assert jnp.allclose(out, ref, atol=1e-2, rtol=1e-2), (
        f"mismatch vs reference, max abs err {jnp.max(jnp.abs(out - ref))}")

    print("KERNEL_OK")
</pallas_src>

<mosaic_0001>
module attributes {stable_mosaic.version = 11 : i64} {
  func.func @_cbt_kernel(%arg0: i32, %arg1: i32, %arg2: memref<2x8x32xf32, #tpu.memory_space<vmem>>, %arg3: memref<1x32x1xf32, #tpu.memory_space<vmem>>, %arg4: memref<1x32x1xf32, #tpu.memory_space<vmem>>, %arg5: memref<1x96x32xf32, #tpu.memory_space<vmem>>, %arg6: memref<1x32x32xf32, #tpu.memory_space<vmem>>, %arg7: memref<1x32x1xf32, #tpu.memory_space<vmem>>, %arg8: memref<2x8x32xf32, #tpu.memory_space<vmem>>, %arg9: memref<32x16xf32, #tpu.memory_space<vmem>>) attributes {dimension_semantics = [#tpu.dimension_semantics<parallel>, #tpu.dimension_semantics<arbitrary>], iteration_bounds = array<i64: 1, 2>, scalar_prefetch = 0 : i64, scratch_operands = 1 : i64, tpu.core_type = #tpu.core_type<tc>, window_params = [{transform_indices = @transform_0, window_bounds = array<i64: 2, 8, 32>}, {transform_indices = @transform_1, window_bounds = array<i64: 1, 32, 1>}, {transform_indices = @transform_2, window_bounds = array<i64: 1, 32, 1>}, {transform_indices = @transform_3, window_bounds = array<i64: 1, 96, 32>}, {transform_indices = @transform_4, window_bounds = array<i64: 1, 32, 32>}, {transform_indices = @transform_5, window_bounds = array<i64: 1, 32, 1>}, {transform_indices = @transform_6, window_bounds = array<i64: 2, 8, 32>}]} {
    %c0_i32 = arith.constant 0 : i32
    %0 = arith.cmpi eq, %arg1, %c0_i32 : i32
    %1 = arith.extui %0 : i1 to i32
    %c0_i32_0 = arith.constant 0 : i32
    %2 = arith.cmpi ne, %1, %c0_i32_0 : i32
    scf.if %2 {
      %c0_35 = arith.constant 0 : index
      %c0_36 = arith.constant 0 : index
      %c0_37 = arith.constant 0 : index
      %89 = vector.load %arg2[%c0_35, %c0_36, %c0_37] : memref<2x8x32xf32, #tpu.memory_space<vmem>>, vector<2x8x32xf32>
      %90 = vector.shape_cast %89 : vector<2x8x32xf32> to vector<16x32xf32>
      %91 = tpu.transpose %90, [1, 0] : vector<16x32xf32> -> vector<32x16xf32>
      %c0_38 = arith.constant 0 : index
      %c0_39 = arith.constant 0 : index
      %92 = vector.load %arg9[%c0_38, %c0_39] : memref<32x16xf32, #tpu.memory_space<vmem>>, vector<32x16xf32>
      tpu.vector_store %arg9[%c0_38, %c0_39], %91 {strides = array<i32>} : memref<32x16xf32, #tpu.memory_space<vmem>>, vector<32x16xf32>,
    } else {
    }
    %c0 = arith.constant 0 : index
    %c0_1 = arith.constant 0 : index
    %3 = vector.load %arg9[%c0, %c0_1] : memref<32x16xf32, #tpu.memory_space<vmem>>, vector<32x16xf32>
    %cst = arith.constant dense<0.000000e+00> : vector<16xf32>
    %4 = vector.multi_reduction <add>, %3, %cst [0] : vector<32x16xf32> to vector<16xf32>
    %5 = vector.shape_cast %4 : vector<16xf32> to vector<1x16xf32>
    %cst_2 = arith.constant 3.200000e+01 : f32
    %6 = vector.broadcast %cst_2 : f32 to vector<1x16xf32>
    %7 = arith.divf %5, %6 : vector<1x16xf32>
    %8 = vector.broadcast %7 : vector<1x16xf32> to vector<32x16xf32>
    %9 = arith.subf %3, %8 : vector<32x16xf32>
    %10 = arith.mulf %9, %9 : vector<32x16xf32>
    %cst_3 = arith.constant dense<0.000000e+00> : vector<16xf32>
    %11 = vector.multi_reduction <add>, %10, %cst_3 [0] : vector<32x16xf32> to vector<16xf32>
    %12 = vector.shape_cast %11 : vector<16xf32> to vector<1x16xf32>
    %cst_4 = arith.constant 3.200000e+01 : f32
    %13 = vector.broadcast %cst_4 : f32 to vector<1x16xf32>
    %14 = arith.divf %12, %13 : vector<1x16xf32>
    %c0_5 = arith.constant 0 : index
    %c0_6 = arith.constant 0 : index
    %c0_7 = arith.constant 0 : index
    %15 = vector.load %arg3[%c0_5, %c0_6, %c0_7] : memref<1x32x1xf32, #tpu.memory_space<vmem>>, vector<1x32x1xf32>
    %16 = vector.shape_cast %15 : vector<1x32x1xf32> to vector<32x1xf32>
    %c0_8 = arith.constant 0 : index
    %c0_9 = arith.constant 0 : index
    %c0_10 = arith.constant 0 : index
    %17 = vector.load %arg4[%c0_8, %c0_9, %c0_10] : memref<1x32x1xf32, #tpu.memory_space<vmem>>, vector<1x32x1xf32>
    %18 = vector.shape_cast %17 : vector<1x32x1xf32> to vector<32x1xf32>
    %cst_11 = arith.constant 9.99999974E-6 : f32
    %19 = vector.broadcast %cst_11 : f32 to vector<1x16xf32>
    %20 = arith.addf %14, %19 : vector<1x16xf32>
    %21 = math.rsqrt %20 : vector<1x16xf32>
    %22 = vector.broadcast %21 : vector<1x16xf32> to vector<32x16xf32>
    %23 = arith.mulf %9, %22 : vector<32x16xf32>
    %24 = vector.broadcast %16 : vector<32x1xf32> to vector<32x16xf32>
    %25 = arith.mulf %23, %24 : vector<32x16xf32>
    %26 = vector.broadcast %18 : vector<32x1xf32> to vector<32x16xf32>
    %27 = arith.addf %25, %26 : vector<32x16xf32>
    %c0_12 = arith.constant 0 : index
    %c0_13 = arith.constant 0 : index
    %c0_14 = arith.constant 0 : index
    %28 = vector.load %arg5[%c0_12, %c0_13, %c0_14] : memref<1x96x32xf32, #tpu.memory_space<vmem>>, vector<1x96x32xf32>
    %29 = vector.shape_cast %28 : vector<1x96x32xf32> to vector<96x32xf32>
    %cst_15 = arith.constant dense<0.000000e+00> : vector<96x16xf32>
    %30 = tpu.matmul %29, %27, %cst_15 {dimension_numbers = #tpu.dot_dimension_numbers<[1], [0], [0], [1], [0, 0, 1, 1], [], []>} : vector<96x32xf32>, vector<32x16xf32>, vector<96x16xf32> -> vector<96x16xf32>
    %c0_16 = arith.constant 0 : index
    %c0_17 = arith.constant 0 : index
    %c0_18 = arith.constant 0 : index
    %31 = vector.load %arg6[%c0_16, %c0_17, %c0_18] : memref<1x32x32xf32, #tpu.memory_space<vmem>>, vector<1x32x32xf32>
    %32 = vector.shape_cast %31 : vector<1x32x32xf32> to vector<32x32xf32>
    %c0_19 = arith.constant 0 : index
    %c0_20 = arith.constant 0 : index
    %c0_21 = arith.constant 0 : index
    %33 = vector.load %arg7[%c0_19, %c0_20, %c0_21] : memref<1x32x1xf32, #tpu.memory_space<vmem>>, vector<1x32x1xf32>
    %34 = vector.shape_cast %33 : vector<1x32x1xf32> to vector<32x1xf32>
    %35 = vector.extract_strided_slice %30 {offsets = [0, 0], sizes = [96, 8], strides = [1, 1]} : vector<96x16xf32> to vector<96x8xf32>
    %36 = vector.shape_cast %35 : vector<96x8xf32> to vector<3x4x8x8xf32>
    %37 = vector.extract_strided_slice %36 {offsets = [0, 0, 0, 0], sizes = [1, 4, 8, 8], strides = [1, 1, 1, 1]} : vector<3x4x8x8xf32> to vector<1x4x8x8xf32>
    %38 = vector.shape_cast %37 : vector<1x4x8x8xf32> to vector<4x8x8xf32>
    %39 = vector.extract_strided_slice %36 {offsets = [1, 0, 0, 0], sizes = [1, 4, 8, 8], strides = [1, 1, 1, 1]} : vector<3x4x8x8xf32> to vector<1x4x8x8xf32>
    %40 = vector.shape_cast %39 : vector<1x4x8x8xf32> to vector<4x8x8xf32>
    %41 = vector.extract_strided_slice %36 {offsets = [2, 0, 0, 0], sizes = [1, 4, 8, 8], strides = [1, 1, 1, 1]} : vector<3x4x8x8xf32> to vector<1x4x8x8xf32>
    %42 = vector.shape_cast %41 : vector<1x4x8x8xf32> to vector<4x8x8xf32>
    %43 = tpu.transpose %38, [0, 2, 1] : vector<4x8x8xf32> -> vector<4x8x8xf32>
    %cst_22 = arith.constant dense<0.000000e+00> : vector<4x8x8xf32>
    %44 = tpu.matmul %43, %40, %cst_22 {dimension_numbers = #tpu.dot_dimension_numbers<[2], [1], [1], [2], [0, 0, 0, 1, 1, 2], [0], [0]>} : vector<4x8x8xf32>, vector<4x8x8xf32>, vector<4x8x8xf32> -> vector<4x8x8xf32>
    %cst_23 = arith.constant dense<0xFF800000> : vector<4x8xf32>
    %45 = vector.multi_reduction <maximumf>, %44, %cst_23 [2] : vector<4x8x8xf32> to vector<4x8xf32>
    %46 = vector.shape_cast %45 : vector<4x8xf32> to vector<4x8x1xf32>
    %47 = vector.broadcast %46 : vector<4x8x1xf32> to vector<4x8x8xf32>
    %48 = arith.subf %44, %47 : vector<4x8x8xf32>
    %49 = math.exp %48 : vector<4x8x8xf32>
    %cst_24 = arith.constant dense<0.000000e+00> : vector<4x8xf32>
    %50 = vector.multi_reduction <add>, %49, %cst_24 [2] : vector<4x8x8xf32> to vector<4x8xf32>
    %cst_25 = arith.constant dense<0.000000e+00> : vector<4x8x8xf32>
    %51 = tpu.matmul %42, %49, %cst_25 {dimension_numbers = #tpu.dot_dimension_numbers<[2], [2], [1], [1], [0, 0, 0, 1, 1, 1], [0], [0]>} : vector<4x8x8xf32>, vector<4x8x8xf32>, vector<4x8x8xf32> -> vector<4x8x8xf32>
    %52 = tpu.reciprocal %50 {approx = true} : vector<4x8xf32> -> vector<4x8xf32>
    %53 = vector.shape_cast %52 : vector<4x8xf32> to vector<4x1x8xf32>
    %54 = vector.broadcast %53 : vector<4x1x8xf32> to vector<4x8x8xf32>
    %55 = arith.mulf %51, %54 : vector<4x8x8xf32>
    %56 = vector.shape_cast %55 : vector<4x8x8xf32> to vector<32x8xf32>
    %cst_26 = arith.constant dense<0.000000e+00> : vector<32x8xf32>
    %57 = tpu.matmul %32, %56, %cst_26 {dimension_numbers = #tpu.dot_dimension_numbers<[1], [0], [0], [1], [0, 0, 1, 1], [], []>} : vector<32x32xf32>, vector<32x8xf32>, vector<32x8xf32> -> vector<32x8xf32>
    %58 = vector.extract_strided_slice %30 {offsets = [0, 8], sizes = [96, 8], strides = [1, 1]} : vector<96x16xf32> to vector<96x8xf32>
    %59 = vector.shape_cast %58 : vector<96x8xf32> to vector<3x4x8x8xf32>
    %60 = vector.extract_strided_slice %59 {offsets = [0, 0, 0, 0], sizes = [1, 4, 8, 8], strides = [1, 1, 1, 1]} : vector<3x4x8x8xf32> to vector<1x4x8x8xf32>
    %61 = vector.shape_cast %60 : vector<1x4x8x8xf32> to vector<4x8x8xf32>
    %62 = vector.extract_strided_slice %59 {offsets = [1, 0, 0, 0], sizes = [1, 4, 8, 8], strides = [1, 1, 1, 1]} : vector<3x4x8x8xf32> to vector<1x4x8x8xf32>
    %63 = vector.shape_cast %62 : vector<1x4x8x8xf32> to vector<4x8x8xf32>
    %64 = vector.extract_strided_slice %59 {offsets = [2, 0, 0, 0], sizes = [1, 4, 8, 8], strides = [1, 1, 1, 1]} : vector<3x4x8x8xf32> to vector<1x4x8x8xf32>
    %65 = vector.shape_cast %64 : vector<1x4x8x8xf32> to vector<4x8x8xf32>
    %66 = tpu.transpose %61, [0, 2, 1] : vector<4x8x8xf32> -> vector<4x8x8xf32>
    %cst_27 = arith.constant dense<0.000000e+00> : vector<4x8x8xf32>
    %67 = tpu.matmul %66, %63, %cst_27 {dimension_numbers = #tpu.dot_dimension_numbers<[2], [1], [1], [2], [0, 0, 0, 1, 1, 2], [0], [0]>} : vector<4x8x8xf32>, vector<4x8x8xf32>, vector<4x8x8xf32> -> vector<4x8x8xf32>
    %cst_28 = arith.constant dense<0xFF800000> : vector<4x8xf32>
    %68 = vector.multi_reduction <maximumf>, %67, %cst_28 [2] : vector<4x8x8xf32> to vector<4x8xf32>
    %69 = vector.shape_cast %68 : vector<4x8xf32> to vector<4x8x1xf32>
    %70 = vector.broadcast %69 : vector<4x8x1xf32> to vector<4x8x8xf32>
    %71 = arith.subf %67, %70 : vector<4x8x8xf32>
    %72 = math.exp %71 : vector<4x8x8xf32>
    %cst_29 = arith.constant dense<0.000000e+00> : vector<4x8xf32>
    %73 = vector.multi_reduction <add>, %72, %cst_29 [2] : vector<4x8x8xf32> to vector<4x8xf32>
    %cst_30 = arith.constant dense<0.000000e+00> : vector<4x8x8xf32>
    %74 = tpu.matmul %65, %72, %cst_30 {dimension_numbers = #tpu.dot_dimension_numbers<[2], [2], [1], [1], [0, 0, 0, 1, 1, 1], [0], [0]>} : vector<4x8x8xf32>, vector<4x8x8xf32>, vector<4x8x8xf32> -> vector<4x8x8xf32>
    %75 = tpu.reciprocal %73 {approx = true} : vector<4x8xf32> -> vector<4x8xf32>
    %76 = vector.shape_cast %75 : vector<4x8xf32> to vector<4x1x8xf32>
    %77 = vector.broadcast %76 : vector<4x1x8xf32> to vector<4x8x8xf32>
    %78 = arith.mulf %74, %77 : vector<4x8x8xf32>
    %79 = vector.shape_cast %78 : vector<4x8x8xf32> to vector<32x8xf32>
    %cst_31 = arith.constant dense<0.000000e+00> : vector<32x8xf32>
    %80 = tpu.matmul %32, %79, %cst_31 {dimension_numbers = #tpu.dot_dimension_numbers<[1], [0], [0], [1], [0, 0, 1, 1], [], []>} : vector<32x32xf32>, vector<32x8xf32>, vector<32x8xf32> -> vector<32x8xf32>
    %81 = tpu.concatenate %57, %80 in 1 : vector<32x8xf32>, vector<32x8xf32> -> vector<32x16xf32>
    %82 = arith.addf %3, %81 : vector<32x16xf32>
    %83 = vector.broadcast %34 : vector<32x1xf32> to vector<32x16xf32>
    %84 = arith.addf %82, %83 : vector<32x16xf32>
    %c0_32 = arith.constant 0 : index
    %c0_33 = arith.constant 0 : index
    %85 = vector.load %arg9[%c0_32, %c0_33] : memref<32x16xf32, #tpu.memory_space<vmem>>, vector<32x16xf32>
    tpu.vector_store %arg9[%c0_32, %c0_33], %84 {strides = array<i32>} : memref<32x16xf32, #tpu.memory_space<vmem>>, vector<32x16xf32>,
    %c1_i32 = arith.constant 1 : i32
    %86 = arith.cmpi eq, %arg1, %c1_i32 : i32
    %87 = arith.extui %86 : i1 to i32
    %c0_i32_34 = arith.constant 0 : i32
    %88 = arith.cmpi ne, %87, %c0_i32_34 : i32
    scf.if %88 {
      %c0_35 = arith.constant 0 : index
      %c0_36 = arith.constant 0 : index
      %89 = vector.load %arg9[%c0_35, %c0_36] : memref<32x16xf32, #tpu.memory_space<vmem>>, vector<32x16xf32>
      %90 = tpu.transpose %89, [1, 0] : vector<32x16xf32> -> vector<16x32xf32>
      %91 = vector.shape_cast %90 : vector<16x32xf32> to vector<2x8x32xf32>
      %c0_37 = arith.constant 0 : index
      %c0_38 = arith.constant 0 : index
      %c0_39 = arith.constant 0 : index
      %92 = vector.load %arg8[%c0_37, %c0_38, %c0_39] : memref<2x8x32xf32, #tpu.memory_space<vmem>>, vector<2x8x32xf32>
      tpu.vector_store %arg8[%c0_37, %c0_38, %c0_39], %91 {strides = array<i32>} : memref<2x8x32xf32, #tpu.memory_space<vmem>>, vector<2x8x32xf32>,
    } else {
    }
    return
  }
  func.func @transform_0(%arg0: i32, %arg1: i32) -> (i32, i32, i32) {
    %c0_i32 = arith.constant 0 : i32
    %c0_i32_0 = arith.constant 0 : i32
    %c0_i32_1 = arith.constant 0 : i32
    return %arg0, %c0_i32, %c0_i32_0 : i32, i32, i32
  }
  func.func @transform_1(%arg0: i32, %arg1: i32) -> (i32, i32, i32) {
    %c0_i32 = arith.constant 0 : i32
    %c0_i32_0 = arith.constant 0 : i32
    %c0_i32_1 = arith.constant 0 : i32
    return %arg1, %c0_i32, %c0_i32_0 : i32, i32, i32
  }
  func.func @transform_2(%arg0: i32, %arg1: i32) -> (i32, i32, i32) {
    %c0_i32 = arith.constant 0 : i32
    %c0_i32_0 = arith.constant 0 : i32
    %c0_i32_1 = arith.constant 0 : i32
    return %arg1, %c0_i32, %c0_i32_0 : i32, i32, i32
  }
  func.func @transform_3(%arg0: i32, %arg1: i32) -> (i32, i32, i32) {
    %c0_i32 = arith.constant 0 : i32
    %c0_i32_0 = arith.constant 0 : i32
    %c0_i32_1 = arith.constant 0 : i32
    return %arg1, %c0_i32, %c0_i32_0 : i32, i32, i32
  }
  func.func @transform_4(%arg0: i32, %arg1: i32) -> (i32, i32, i32) {
    %c0_i32 = arith.constant 0 : i32
    %c0_i32_0 = arith.constant 0 : i32
    %c0_i32_1 = arith.constant 0 : i32
    return %arg1, %c0_i32, %c0_i32_0 : i32, i32, i32
  }
  func.func @transform_5(%arg0: i32, %arg1: i32) -> (i32, i32, i32) {
    %c0_i32 = arith.constant 0 : i32
    %c0_i32_0 = arith.constant 0 : i32
    %c0_i32_1 = arith.constant 0 : i32
    return %arg1, %c0_i32, %c0_i32_0 : i32, i32, i32
  }
  func.func @transform_6(%arg0: i32, %arg1: i32) -> (i32, i32, i32) {
    %c0_i32 = arith.constant 0 : i32
    %c0_i32_0 = arith.constant 0 : i32
    %c0_i32_1 = arith.constant 0 : i32
    return %arg0, %c0_i32, %c0_i32_0 : i32, i32, i32
  }
}

</mosaic_0001>

<bundles_post_ra>
// kernel: tpu_custom_call.1
= control target key start
LH: loop header
LB: loop body
LE: loop exit
PB: predicated region body
PF: predicated region fallthrough
CT: control target
= control target key end

     0   :  { %11 = vsyncpa [#allocation4], 0  ;;  %s3227_s21 = smov 0   ;;  %s3229_s22 = smov 0   ;;  %s3548_s0 = inlined_call_operand.vmem [shape: f32[2,8,32], index: 0, kind: input, shape index: {}]   ;;  %s3549_s1 = inlined_call_operand.vmem [shape: f32[2,32,1], index: 1, kind: input, shape index: {}]   ;;  %s3550_s2 = inlined_call_operand.vmem [shape: f32[2,32,1], index: 2, kind: input, shape index: {}]   ;;  %s3551_s3 = inlined_call_operand.vmem [shape: f32[2,96,32], index: 3, kind: input, shape index: {}]   ;;  %s3552_s4 = inlined_call_operand.vmem [shape: f32[2,32,32], index: 4, kind: input, shape index: {}]   ;;  %s3553_s5 = inlined_call_operand.vmem [shape: f32[2,32,1], index: 5, kind: input, shape index: {}]   ;;  %s3554_s6 = inlined_call_operand.hbm [shape: f32[2,8,32], index: 6, kind: output, shape index: {}]  }
   0x1   :  { %s3231_s23 = smov 0  }
   0x2 LB: > { %s2765_s24 = sadd.s32 4294967295, %s3183_s23   ;;  %s26_s25 = sadd.s32 1, %s3179_s22  ;;  %s3183_s23 = sphi %s3231_s23, %s17_s23   ;;  %s3179_s22 = sphi %s3229_s22, %s3557_s22   ;;  %s3175_s21 = sphi %s3227_s21, %s3556_s21  }
   0x3   : > { %p27_p0 = scmp.ge.s32.totalorder %s26_s25, 2  ;;  %p2769_p1 = scmp.ge.s32.totalorder %s3183_s23, 1 }
   0x4   : > { %p276_p2 = scmp.lt.s32.totalorder %s3183_s23, 3 }
   0x5   : > { %s3559_s25 = smov (%p27_p0, %s26_s25), 0 }
   0x6   : > { %p277_p3 = pnand %p2769_p1, %p276_p2 }
   0x7   : > { %p332_p4 = scmp.lt.s32.totalorder (!%p277_p3), %s3175_s21, 1  ;;  %p2779_p5 = scmp.ne.s32.totalorder (!%p277_p3), %s3175_s21, 0 }
   0x8   : > { %280 = sbr.rel (%p277_p3) target bundleno = 2204 (0x89c), region = 44 }
   0xf   : > { %s333_s26 = scalar_select %p332_p4, %s3175_s21, 1 }
  0x10   : > { %361 = sbr.rel (%p2779_p5) target bundleno = 159 (0x9f), region = 48  ;;  %v362_v0 = vld [vmem:[%s3548_s0] sm:$0xff] (!%p2779_p5)  ;;  %v363_v1 = vld [vmem:[%s3548_s0 + $0x8] sm:$0xff] (!%p2779_p5)  ;;  %vm396_vm0 = vcmask (!%p2779_p5), 130048  }
  0x11   : > { %s2829_s27 = sshll.u32 %s333_s26, 5  ;;  %s3055_s28 = smul.u32 96, %s333_s26  ;;  %364 = vxpose.xlu0.b32.start [1/2] (short) (narrow) (!%p2779_p5), %v362_v0, 32 }
  0x12   : > { %s3253_s7 = scalar_lea.vmem %s3549_s1, %s2829_s27  ;;  %s3258_s10 = scalar_lea.vmem %s3550_s2, %s2829_s27 }
  0x13   : > { %s3263_s13 = scalar_lea.vmem %s3551_s3, %s3055_s28  ;;  %s3268_s16 = scalar_lea.vmem %s3552_s4, %s2829_s27 }
  0x14   : > { %s3273_s19 = scalar_lea.vmem %s3553_s5, %s2829_s27 }
  0x15   : > { %365 = vxpose.xlu0.b32.end [2/2] (short) (narrow) (!%p2779_p5), %v363_v1, 32 }
  0x91   : > { %v380_v2 = vpop.trf.xlu0 }
  0x92   : > { %397 = vst.msk [vmem:[#allocation2] sm:$0xff] %vm396_vm0, %v380_v2 }
  0x95   : > { %v381_v3 = vpop.trf.xlu0 }
  0x96   : > { %398 = vst.msk [vmem:[#allocation2 + $0x8] sm:$0xff] %vm396_vm0, %v381_v3 }
  0x99   : > { %v382_v4 = vpop.trf.xlu0 }
  0x9a   : > { %399 = vst.msk [vmem:[#allocation2 + $0x10] sm:$0xff] %vm396_vm0, %v382_v4 }
  0x9d   : > { %v383_v5 = vpop.trf.xlu0 }
  0x9e   : > { %400 = vst.msk [vmem:[#allocation2 + $0x18] sm:$0xff] %vm396_vm0, %v383_v5 }
  0x9f PF: > { %v447_v6 = vld [vmem:[%s3258_s10] sm:$0xff]  ;;  %v3185_v8 = vmov 0   ;;  %v448_v9 = vld [vmem:[%s3258_s10 + $0x8] sm:$0xff]  ;;  %v446_v11 = vld [vmem:[%s3253_s7 + $0x18] sm:$0xff]  ;;  %vm405_vm1 = vcmask 130048   ;;  %vm517_vm2 = vcmask 261120  }
  0xa0   : > { %v443_v7 = vld [vmem:[%s3253_s7] sm:$0xff]  ;;  %3096 = vset.pattern.permute.xlu1 %v3185_v8  ;;  %3095 = vset.pattern.permute.xlu0 %v3185_v8  ;;  %v444_v10 = vld [vmem:[%s3253_s7 + $0x8] sm:$0xff]  ;;  %v445_v12 = vld [vmem:[%s3253_s7 + $0x10] sm:$0xff]  ;;  %vm3187_vm3 = vmmov 0   ;;  %s3188_s27 = smov 120   ;;  %vm815_vm4 = vcmask 64512  }
  0xa1   : > { %483 = vperm.xlu1 %3096, %v447_v6   ;;  %459 = vperm.xlu0 %3095, %v443_v7   ;;  %v450_v13 = vld [vmem:[%s3258_s10 + $0x18] sm:$0xff]  ;;  %v449_v14 = vld [vmem:[%s3258_s10 + $0x10] sm:$0xff]  ;;  %v3290_v15 = vld [vmem:[#allocation2] sm:$0xff]  ;;  %s3189_s30 = smov 8   ;;  %p2824_p6 = scmp.ne.s32.totalorder %s3175_s21, 1 }
  0xa2   : > { %v3292_v16 = vld [vmem:[#allocation2 + $0x8] sm:$0xff]  ;;  %v406_v17 = vsel %vm405_vm1, %v3290_v15, 0.0  ;;  %v3298_v19 = vld [vmem:[#allocation2 + $0x10] sm:$0xff]  ;;  %v505_v20 = vld [vmem:[%s3263_s13] sm:$0xff] }
  0xa3   : > { %v407_v18 = vsel %vm405_vm1, %v3292_v16, 0.0  ;;  %2905 = vmatprep.mubr.msk.f32.mxu0 %vm517_vm2, %v505_v20  ;;  %v409_v22 = vsel %vm405_vm1, %v3298_v19, 0.0  ;;  %v507_v20 = vld [vmem:[%s3263_s13 + $0x10] sm:$0xff] }
  0xa4   : > { %v408_v21 = vadd.f32 %v407_v18, %v406_v17  ;;  %v506_v18 = vld [vmem:[%s3263_s13 + $0x8] sm:$0xff] }
  0xa5   : > { %488 = vperm.xlu1 %3096, %v448_v9   ;;  %464 = vperm.xlu0 %3095, %v444_v10   ;;  %v3304_v23 = vld [vmem:[#allocation2 + $0x18] sm:$0xff] }
  0xa6   : > { %v410_v24 = vadd.f32 %v409_v22, %v408_v21  ;;  %v411_v25 = vsel %vm405_vm1, %v3304_v23, 0.0  ;;  %v508_v21 = vld [vmem:[%s3263_s13 + $0x18] sm:$0xff]  ;;  %v509_v22 = vld [vmem:[%s3263_s13 + $0x20] sm:$0xff] }
  0xa8   : > { %v412_v26 = vadd.f32 %v411_v25, %v410_v24  ;;  %v510_v24 = vld [vmem:[%s3263_s13 + $0x28] sm:$0xff]  ;;  %v511_v25 = vld [vmem:[%s3263_s13 + $0x30] sm:$0xff] }
  0xa9   : > { %474 = vperm.xlu1 %3096, %v446_v11   ;;  %469 = vperm.xlu0 %3095, %v445_v12  }
  0xaa   : > { %v413_v27 = vrot.slane %v412_v26, 4 }
  0xac   : > { %v414_v28 = vadd.f32 %v413_v27, %v412_v26  ;;  %v512_v26 = vld [vmem:[%s3263_s13 + $0x38] sm:$0xff]  ;;  %v3186_v27 = vmov 0.0  }
  0xad   : > { %498 = vperm.xlu1 %3096, %v450_v13   ;;  %493 = vperm.xlu0 %3095, %v449_v14  }
  0xae   : > { %v415_v29 = vrot.slane %v414_v28, 2  ;;  %2923 = vmatprep.subr.mxu1 %v3186_v27  ;;  %2925 = vmatprep.mubr.msk.f32.mxu1 %vm3187_vm3, %v3186_v27 }
  0xb0   : > { %v416_v30 = vadd.f32 %v415_v29, %v414_v28 }
  0xb2   : > { %v417_v31 = vrot.slane %v416_v30, 1 }
  0xb4   : > { %v418_v32 = vadd.f32 %v417_v31, %v416_v30 }
  0xb6   : > { %v420_v33 = vmul.f32 0.03125, %v418_v32 }
  0xb8   : > { %v421_v34 = vsub.f32 %v3290_v15, %v420_v33  ;;  %v422_v35 = vsub.f32 %v3292_v16, %v420_v33  ;;  %v423_v36 = vsub.f32 %v3298_v19, %v420_v33  ;;  %v424_v39 = vsub.f32 %v3304_v23, %v420_v33 }
  0xba   : > { %v425_v37 = vmul.f32 %v421_v34, %v421_v34  ;;  %v426_v38 = vmul.f32 %v422_v35, %v422_v35  ;;  %v427_v40 = vmul.f32 %v423_v36, %v423_v36  ;;  %v428_v44 = vmul.f32 %v424_v39, %v424_v39 }
  0xbc   : > { %v429_v41 = vsel %vm405_vm1, %v425_v37, 0.0  ;;  %v430_v42 = vsel %vm405_vm1, %v426_v38, 0.0  ;;  %v432_v45 = vsel %vm405_vm1, %v427_v40, 0.0  ;;  %v434_v47 = vsel %vm405_vm1, %v428_v44, 0.0  ;;  %v514_v37 = vld [vmem:[%s3263_s13 + $0x48] sm:$0xff]  ;;  %v515_v38 = vld [vmem:[%s3263_s13 + $0x50] sm:$0xff] }
  0xbd   : > { %v431_v43 = vadd.f32 %v430_v42, %v429_v41 }
  0xbf   : > { %v433_v46 = vadd.f32 %v432_v45, %v431_v43 }
  0xc1   : > { %v435_v48 = vadd.f32 %v434_v47, %v433_v46 }
  0xc3   : > { %v436_v49 = vrot.slane %v435_v48, 4 }
  0xc5   : > { %v437_v50 = vadd.f32 %v436_v49, %v435_v48 }
  0xc7   : > { %v438_v51 = vrot.slane %v437_v50, 2 }
  0xc9   : > { %v439_v52 = vadd.f32 %v438_v51, %v437_v50 }
  0xcb   : > { %v440_v53 = vrot.slane %v439_v52, 1 }
  0xcd   : > { %v441_v54 = vadd.f32 %v440_v53, %v439_v52 }
  0xcf   : > { %v442_v55 = vmul.f32 0.03125, %v441_v54 }
  0xd1   : > { %v451_v56 = vadd.f32 1e-05, %v442_v55 }
  0xd3   : > { %3097 = vrsqrt.f32 %v451_v56 }
  0xdd   : > { %v3098_v57 = vpop.eup %3097 }
  0xde   : > { %v453_v58 = vmul.f32 %v3098_v57, %v421_v34  ;;  %v454_v61 = vmul.f32 %v3098_v57, %v422_v35  ;;  %v456_v4 = vmul.f32 %v3098_v57, %v424_v39  ;;  %v455_v5 = vmul.f32 %v3098_v57, %v423_v36  ;;  %v513_v36 = vld [vmem:[%s3263_s13 + $0x40] sm:$0xff]  ;;  %v516_v39 = vld [vmem:[%s3263_s13 + $0x58] sm:$0xff] }
 0x120   : > { %v484_v59 = vpop.permute.xlu1 %483  ;;  %v460_v60 = vpop.permute.xlu0 %459 }
 0x121   : > { %v477_v62 = vmul.f32 %v460_v60, %v453_v58 }
 0x123   : > { %v501_v2 = vadd.f32 %v484_v59, %v477_v62 }
 0x124   : > { %v489_v63 = vpop.permute.xlu1 %488  ;;  %v465_v0 = vpop.permute.xlu0 %464 }
 0x125   : > { %v478_v1 = vmul.f32 %v465_v0, %v454_v61 }
 0x127   : > { %v502_v3 = vadd.f32 %v489_v63, %v478_v1 }
 0x128   : > { %v475_v6 = vpop.permute.xlu1 %474  ;;  %v470_v7 = vpop.permute.xlu0 %469 }
 0x129   : > { %v3031_v8 = vpack.c.bf16 %v502_v3, %v501_v2  ;;  %v480_v9 = vmul.f32 %v475_v6, %v456_v4  ;;  %v479_v10 = vmul.f32 %v470_v7, %v455_v5 }
 0x12b   : > { %3032 = vmatprep.subr.bf16.mxu0 %v3031_v8 }
 0x12c   : > { %v499_v11 = vpop.permute.xlu1 %498  ;;  %v494_v12 = vpop.permute.xlu0 %493  ;;  %3034 = vmatpush3.bf16.msra.mxu0 %v3031_v8 }
 0x12d   : > { %v504_v13 = vadd.f32 %v499_v11, %v480_v9  ;;  %v503_v14 = vadd.f32 %v494_v12, %v479_v10 }
 0x12f   : > { %v3035_v17 = vpack.c.bf16 %v504_v13, %v503_v14 }
 0x131   : > { %3036 = vmatprep.subr.bf16.mxu0 %v3035_v17 }
 0x132   : > { %3038 = vmatpush3.bf16.msra.mxu0 %v3035_v17 }
 0x135   : > { %2906 = vmatmul.mubr.msk.f32.vlgmr.msra.gmra.mrb[0].mxu0 %vm517_vm2, %v506_v18 }
 0x136   : > { %2908 = vmatprep.mubr.msk.f32.mxu0 %vm517_vm2, %v507_v20 }
 0x139   : > { %2909 = vmatmul.mubr.msk.f32.gmra.mrb[2].mxu0 %vm517_vm2, %v508_v21 }
 0x13a   : > { %2911 = vmatprep.mubr.msk.f32.mxu0 %vm517_vm2, %v509_v22 }
 0x13d   : > { %2912 = vmatmul.mubr.msk.f32.gmra.mrb[4].mxu0 %vm517_vm2, %v510_v24 }
 0x13e   : > { %2914 = vmatprep.mubr.msk.f32.mxu0 %vm517_vm2, %v511_v25 }
 0x141   : > { %2915 = vmatmul.mubr.msk.f32.gmra.mrb[6].mxu0 %vm517_vm2, %v512_v26 }
 0x142   : > { %2917 = vmatprep.mubr.msk.f32.mxu0 %vm517_vm2, %v513_v36 }
 0x145   : > { %2918 = vmatmul.mubr.msk.f32.gmra.mrb[8].mxu0 %vm517_vm2, %v514_v37 }
 0x146   : > { %2920 = vmatprep.mubr.msk.f32.mxu0 %vm517_vm2, %v515_v38 }
 0x149   : > { %2921 = vmatmul.mubr.msk.f32.gmra.mrb[10].mxu0 %vm517_vm2, %v516_v39 }
 0x208   : > { %v2907_v28 = vpop.f32.mrb[0].mxu0 }
 0x209   : > { %719 = vxpose.xlu1.b32.start.end [1/1] (short) (narrow) %v2907_v28, 8  ;;  %v620_v29 = vpop.f32.mrb[1].mxu0 }
 0x20a   : > { %687 = vxpose.xlu0.b32.start.end [1/1] (short) (narrow) %v620_v29, 8 }
 0x20c   : > { %v2910_v30 = vpop.f32.mrb[2].mxu0 }
 0x20d   : > { %v630_v31 = vpop.f32.mrb[3].mxu0 }
 0x20e   : > { %751 = vxpose.xlu0.b32.start.end [1/1] (short) (narrow) %v630_v31, 8 }
 0x210   : > { %v2913_v32 = vpop.f32.mrb[4].mxu0 }
 0x211   : > { %v640_v33 = vpop.f32.mrb[5].mxu0 }
 0x212   : > { %783 = vxpose.xlu0.b32.start.end [1/1] (short) (narrow) %v2910_v30, 8  ;;  %2924 = vmatpush3.msra.mxu1 %v640_v33 }
 0x213   : > { %2928 = vmatprep.subr.mxu1 %v3186_v27 }
 0x214   : > { %v2916_v34 = vpop.f32.mrb[6].mxu0 }
 0x215   : > { %v650_v35 = vpop.f32.mrb[7].mxu0 }
 0x218   : > { %v3367_v55 = vpop.f32.mrb[8].mxu0 }
 0x219   : > { %v660_v56 = vpop.f32.mrb[9].mxu0 }
 0x21c   : > { %v3369_v57 = vpop.f32.mrb[10].mxu0 }
 0x21d   : > { %v3371_v58 = vpop.f32.mrb[11].mxu0 }
 0x227   : > { %1613 = vrot.lane.b32.xlu1 %v620_v29, %s3188_s27 }
 0x22b   : > { %1619 = vrot.lane.b32.xlu1 %v2910_v30, %s3188_s27 }
 0x22f   : > { %1617 = vrot.lane.b32.xlu1 %v630_v31, %s3188_s27 }
 0x233   : > { %1831 = vrot.lane.b32.xlu1 %v2913_v32, %s3188_s27 }
 0x23b   : > { %1615 = vrot.lane.b32.xlu0 %v2907_v28, %s3188_s27 }
 0x289   : > { %v735_v41 = vpop.trf.xlu1 }
 0x28a   : > { %v703_v40 = vpop.trf.xlu0 }
 0x28b   : > { %2926 = vmatmul.mubr.msk.f32.vlgmr.msra.gmra.mrb[0].mxu1 %vm815_vm4, %v703_v40 }
 0x28c   : > { %2929 = vmatpush3.msra.mxu1 %v2913_v32  ;;  %2930 = vmatprep.mubr.msk.f32.mxu1 %vm3187_vm3, %v3186_v27 }
 0x28d   : > { %2933 = vmatprep.subr.mxu1 %v3186_v27 }
 0x28e   : > { %v767_v42 = vpop.trf.xlu0 }
 0x28f   : > { %2931 = vmatmul.mubr.msk.f32.vlgmr.msra.gmra.mrb[2].mxu1 %vm815_vm4, %v735_v41 }
 0x290   : > { %2934 = vmatpush3.msra.mxu1 %v650_v35  ;;  %2935 = vmatprep.mubr.msk.f32.mxu1 %vm3187_vm3, %v3186_v27 }
 0x291   : > { %2938 = vmatprep.subr.mxu1 %v3186_v27 }
 0x292   : > { %v799_v43 = vpop.trf.xlu0 }
 0x293   : > { %2936 = vmatmul.mubr.msk.f32.vlgmr.msra.gmra.mrb[4].mxu1 %vm815_vm4, %v767_v42 }
 0x294   : > { %2939 = vmatpush3.msra.mxu1 %v2916_v34  ;;  %2940 = vmatprep.mubr.msk.f32.mxu1 %vm3187_vm3, %v3186_v27 }
 0x295   : > { %2943 = vmatprep.subr.mxu1 %v3186_v27 }
 0x297   : > { %2941 = vmatmul.mubr.msk.f32.vlgmr.msra.gmra.mrb[6].mxu1 %vm815_vm4, %v799_v43 }
 0x298   : > { %2945 = vmatprep.mubr.msk.f32.mxu1 %vm3187_vm3, %v3186_v27 }
 0x299   : > { %v1614_v61 = vpop.permute.xlu1 %1613 }
 0x29d   : > { %v1620_v62 = vpop.permute.xlu1 %1619 }
 0x2a1   : > { %v1618_v63 = vpop.permute.xlu1 %1617 }
 0x2a5   : > { %v1832_v0 = vpop.permute.xlu1 %1831 }
 0x2ad   : > { %v1616_v60 = vpop.permute.xlu0 %1615 }
 0x35e   : > { %v885_v44 = vpop.f32.mrb[0].mxu1 }
 0x35f   : > { %v2927_v45 = vpop.f32.mrb[1].mxu1  ;;  %v1108_v46 = vsel %vm815_vm4, %v885_v44, -inf }
 0x360   : > { %1109 = vmax.xlane.f32.xlu0 %v1108_v46 }
 0x362   : > { %v958_v47 = vpop.f32.mrb[2].mxu1 }
 0x363   : > { %v1111_v48 = vsel %vm815_vm4, %v958_v47, -inf  ;;  %v2932_v49 = vpop.f32.mrb[3].mxu1 }
 0x364   : > { %1112 = vmax.xlane.f32.xlu1 %v1111_v48 }
 0x366   : > { %v1031_v50 = vpop.f32.mrb[4].mxu1 }
 0x367   : > { %v1114_v51 = vsel %vm815_vm4, %v1031_v50, -inf  ;;  %v2937_v52 = vpop.f32.mrb[5].mxu1 }
 0x368   : > { %1115 = vmax.xlane.f32.xlu1 %v1114_v51 }
 0x36a   : > { %v1104_v53 = vpop.f32.mrb[6].mxu1 }
 0x36b   : > { %v2942_v54 = vpop.f32.mrb[7].mxu1  ;;  %v1117_v59 = vsel %vm815_vm4, %v1104_v53, -inf }
 0x376   : > { %1754 = vrot.lane.b32.xlu0 %v640_v33, %s3188_s27 }
 0x379   : > { %1985 = vrot.lane.b32.xlu1 %v2916_v34, %s3188_s27 }
 0x395   : > { %1118 = vmax.xlane.f32.xlu0 %v1117_v59 }
 0x3a2   : > { %1657 = vxpose.xlu1.b32.start.end [1/1] (short) (narrow) %v1616_v60, 8 }
 0x3ab   : > { %1908 = vrot.lane.b32.xlu0 %v650_v35, %s3188_s27  ;;  %v1456_v35 = vlaneseq }
 0x3ad   : > { %v1457_v36 = vand.u32 127, %v1456_v35  ;;  %v1459_v37 = vshrl.u32 %v1456_v35, 7 }
 0x3af   : > { %v3419_v39 = vsub.s32 %v1457_v36, %v1459_v37 }
 0x3c9   : > { %1625 = vxpose.xlu0.b32.start.end [1/1] (short) (narrow) %v1614_v61, 8 }
 0x3cd   : > { %1689 = vxpose.xlu0.b32.start.end [1/1] (short) (narrow) %v1618_v63, 8 }
 0x3d1   : > { %1721 = vxpose.xlu0.b32.start.end [1/1] (short) (narrow) %v1620_v62, 8 }
 0x3ed   : > { %v1110_v1 = vpop.xlane.xlu0 %1109 }
 0x3ee   : > { %v1120_v2 = vsub.f32 %v885_v44, %v1110_v1 }
 0x3f0   : > { %v1124_v3 = vmul.f32 1.442695, %v1120_v2 }
 0x3f1   : > { %v1113_v4 = vpop.xlane.xlu1 %1112  ;;  %v1755_v18 = vpop.permute.xlu0 %1754 }
 0x3f2   : > { %3099 = vpow2.f32 %v1124_v3  ;;  %v1121_v5 = vsub.f32 %v958_v47, %v1113_v4 }
 0x3f4   : > { %v1126_v6 = vmul.f32 1.442695, %v1121_v5 }
 0x3f5   : > { %v1116_v7 = vpop.xlane.xlu1 %1115 }
 0x3f6   : > { %3101 = vpow2.f32 %v1126_v6  ;;  %v1122_v8 = vsub.f32 %v1031_v50, %v1116_v7 }
 0x3f8   : > { %v1128_v9 = vmul.f32 1.442695, %v1122_v8 }
 0x3f9   : > { %v1986_v28 = vpop.permute.xlu1 %1985 }
 0x3fa   : > { %3103 = vpow2.f32 %v1128_v9 }
 0x3fc   : > { %v3100_v10 = vpop.eup %3099 }
 0x3fd   : > { %2944 = vmatpush3.xpose.msk.msra.mxu1 %vm815_vm4, %v3100_v10  ;;  %v1132_v11 = vsel %vm815_vm4, %v3100_v10, 0.0 }
 0x3fe   : > { %1133 = vadd.xlane.f32.xlu0 %v1132_v11  ;;  %2948 = vmatprep.subr.mxu1 %v3186_v27 }
 0x400   : > { %v3102_v12 = vpop.eup %3101  ;;  %2946 = vmatmul.mubr.msk.f32.vlgmr.msra.gmra.mrb[8].mxu1 %vm815_vm4, %v660_v56 }
 0x401   : > { %2949 = vmatpush3.xpose.msk.msra.mxu1 %vm815_vm4, %v3102_v12  ;;  %v1135_v13 = vsel %vm815_vm4, %v3102_v12, 0.0  ;;  %2950 = vmatprep.mubr.msk.f32.mxu1 %vm3187_vm3, %v3186_v27 }
 0x402   : > { %1136 = vadd.xlane.f32.xlu1 %v1135_v13  ;;  %2953 = vmatprep.subr.mxu1 %v3186_v27 }
 0x404   : > { %v3104_v14 = vpop.eup %3103  ;;  %2951 = vmatmul.mubr.msk.f32.vlgmr.msra.gmra.mrb[10].mxu1 %vm815_vm4, %v3367_v55 }
 0x405   : > { %2954 = vmatpush3.xpose.msk.msra.mxu1 %vm815_vm4, %v3104_v14  ;;  %v1138_v17 = vsel %vm815_vm4, %v3104_v14, 0.0  ;;  %2955 = vmatprep.mubr.msk.f32.mxu1 %vm3187_vm3, %v3186_v27  ;;  %v679_v14 = vld [vmem:[%s3268_s16] sm:$0xff] }
 0x406   : > { %1139 = vadd.xlane.f32.xlu1 %v1138_v17  ;;  %2958 = vmatprep.subr.mxu1 %v3186_v27  ;;  %v3433_v17 = vld [vmem:[%s3268_s16 + $0x8] sm:$0xff] }
 0x407   : > { %2971 = vmatprep.mubr.msk.f32.mxu0 %vm517_vm2, %v679_v14 }
 0x408   : > { %2956 = vmatmul.mubr.msk.f32.vlgmr.msra.gmra.mrb[12].mxu1 %vm815_vm4, %v3371_v58 }
 0x409   : > { %2960 = vmatprep.mubr.msk.f32.mxu1 %vm3187_vm3, %v3186_v27 }
 0x417   : > { %2097 = vrot.lane.b32.xlu1 %v660_v56, %s3188_s27 }
 0x422   : > { %v1119_v20 = vpop.xlane.xlu0 %1118  ;;  %v1673_v30 = vpop.trf.xlu1 }
 0x423   : > { %v1123_v21 = vsub.f32 %v1104_v53, %v1119_v20  ;;  %v3445_v20 = vld [vmem:[%s3268_s16 + $0x18] sm:$0xff] }
 0x425   : > { %v1130_v22 = vmul.f32 1.442695, %v1123_v21 }
 0x426   : > { %v1909_v26 = vpop.permute.xlu0 %1908 }
 0x427   : > { %3105 = vpow2.f32 %v1130_v22 }
 0x431   : > { %v3106_v24 = vpop.eup %3105 }
 0x432   : > { %2959 = vmatpush3.xpose.msk.msra.mxu1 %vm815_vm4, %v3106_v24  ;;  %v1141_v25 = vsel %vm815_vm4, %v3106_v24, 0.0 }
 0x433   : > { %1142 = vadd.xlane.f32.xlu0 %v1141_v25  ;;  %2977 = vmatprep.subr.mxu1 %v3186_v27 }
 0x435   : > { %2961 = vmatmul.mubr.msk.f32.vlgmr.msra.gmra.mrb[14].mxu1 %vm815_vm4, %v3369_v57 }
 0x436   : > { %2978 = vmatpush3.msra.mxu1 %v1755_v18  ;;  %2979 = vmatprep.mubr.msk.f32.mxu1 %vm3187_vm3, %v3186_v27  ;;  %v3440_v18 = vld [vmem:[%s3268_s16 + $0x10] sm:$0xff] }
 0x437   : > { %2982 = vmatprep.subr.mxu1 %v3186_v27 }
 0x449   : > { %v1641_v29 = vpop.trf.xlu0 }
 0x44a   : > { %2980 = vmatmul.mubr.msk.f32.vlgmr.msra.gmra.mrb[16].mxu1 %vm815_vm4, %v1641_v29 }
 0x44b   : > { %2983 = vmatpush3.msra.mxu1 %v1832_v0  ;;  %2984 = vmatprep.mubr.msk.f32.mxu1 %vm3187_vm3, %v3186_v27 }
 0x44c   : > { %2987 = vmatprep.subr.mxu1 %v3186_v27 }
 0x44d   : > { %v1705_v31 = vpop.trf.xlu0 }
 0x44e   : > { %2985 = vmatmul.mubr.msk.f32.vlgmr.msra.gmra.mrb[18].mxu1 %vm815_vm4, %v1673_v30 }
 0x44f   : > { %2988 = vmatpush3.msra.mxu1 %v1909_v26  ;;  %2989 = vmatprep.mubr.msk.f32.mxu1 %vm3187_vm3, %v3186_v27 }
 0x450   : > { %2992 = vmatprep.subr.mxu1 %v3186_v27 }
 0x451   : > { %v1737_v32 = vpop.trf.xlu0 }
 0x452   : > { %2990 = vmatmul.mubr.msk.f32.vlgmr.msra.gmra.mrb[20].mxu1 %vm815_vm4, %v1705_v31 }
 0x453   : > { %2993 = vmatpush3.msra.mxu1 %v1986_v28  ;;  %2994 = vmatprep.mubr.msk.f32.mxu1 %vm3187_vm3, %v3186_v27 }
 0x454   : > { %3002 = vmatprep.subr.mxu1 %v3186_v27 }
 0x456   : > { %2995 = vmatmul.mubr.msk.f32.vlgmr.msra.gmra.mrb[22].mxu1 %vm815_vm4, %v1737_v32 }
 0x457   : > { %3004 = vmatprep.mubr.msk.f32.mxu1 %vm3187_vm3, %v3186_v27 }
 0x48b   : > { %v1134_v33 = vpop.xlane.xlu0 %1133 }
 0x48c   : > { %3107 = vrcp.f32 %v1134_v33 }
 0x48f   : > { %v1137_v34 = vpop.xlane.xlu1 %1136 }
 0x490   : > { %3109 = vrcp.f32 %v1137_v34 }
 0x493   : > { %v1140_v52 = vpop.xlane.xlu1 %1139 }
 0x494   : > { %3111 = vrcp.f32 %v1140_v52 }
 0x496   : > { %v3108_v38 = vpop.eup %3107 }
 0x497   : > { %v1461_v43 = vrot.slane %v3108_v38, %v3419_v39 }
 0x49a   : > { %v3110_v40 = vpop.eup %3109 }
 0x49b   : > { %v1465_v44 = vrot.slane %v3110_v40, %v3419_v39 }
 0x49e   : > { %v3112_v54 = vpop.eup %3111 }
 0x49f   : > { %v1469_v59 = vrot.slane %v3112_v54, %v3419_v39 }
 0x4c0   : > { %v1143_v53 = vpop.xlane.xlu0 %1142 }
 0x4c1   : > { %3113 = vrcp.f32 %v1143_v53 }
 0x4cb   : > { %v3114_v56 = vpop.eup %3113 }
 0x4cc   : > { %v1473_v60 = vrot.slane %v3114_v56, %v3419_v39 }
 0x4d3   : > { %v1216_v41 = vpop.f32.mrb[8].mxu1 }
 0x4d4   : > { %v2947_v42 = vpop.f32.mrb[9].mxu1  ;;  %v1508_v46 = vmul.f32 %v1461_v43, %v1216_v41 }
 0x4d7   : > { %v1292_v45 = vpop.f32.mrb[10].mxu1 }
 0x4d8   : > { %v1509_v47 = vmul.f32 %v1465_v44, %v1292_v45  ;;  %v2952_v48 = vpop.f32.mrb[11].mxu1  ;;  %v683_v45 = vld [vmem:[%s3273_s19] sm:$0xff] }
 0x4da   : > { %v3039_v49 = vpack.c.bf16 %v1509_v47, %v1508_v46  ;;  %v685_v46 = vld [vmem:[%s3273_s19 + $0x10] sm:$0xff]  ;;  %v684_v47 = vld [vmem:[%s3273_s19 + $0x8] sm:$0xff] }
 0x4db   : > { %v1368_v50 = vpop.f32.mrb[12].mxu1 }
 0x4dc   : > { %3040 = vmatprep.subr.bf16.mxu0 %v3039_v49  ;;  %v2957_v51 = vpop.f32.mrb[13].mxu1  ;;  %v1510_v62 = vmul.f32 %v1469_v59, %v1368_v50 }
 0x4dd   : > { %3042 = vmatpush3.bf16.msra.mxu0 %v3039_v49 }
 0x508   : > { %v1444_v61 = vpop.f32.mrb[14].mxu1 }
 0x509   : > { %v1511_v63 = vmul.f32 %v1473_v60, %v1444_v61  ;;  %v2962_v0 = vpop.f32.mrb[15].mxu1 }
 0x50b   : > { %v3043_v1 = vpack.c.bf16 %v1511_v63, %v1510_v62 }
 0x50d   : > { %3044 = vmatprep.subr.bf16.mxu0 %v3043_v1 }
 0x50e   : > { %3046 = vmatpush3.bf16.msra.mxu0 %v3043_v1 }
 0x50f   : > { %2997 = vmatprep.subr.mxu0 %v3186_v27 }
 0x511   : > { %2972 = vmatmul.mubr.msk.f32.vlgmr.msra.gmra.mrb[12].mxu0 %vm517_vm2, %v3433_v17 }
 0x512   : > { %2974 = vmatprep.mubr.msk.f32.mxu0 %vm517_vm2, %v3440_v18 }
 0x515   : > { %2975 = vmatmul.mubr.msk.f32.gmra.mrb[14].mxu0 %vm517_vm2, %v3445_v20 }
 0x516   : > { %2999 = vmatprep.mubr.msk.f32.mxu0 %vm3187_vm3, %v3186_v27 }
 0x51d   : > { %v1826_v2 = vpop.f32.mrb[16].mxu1 }
 0x51e   : > { %v2981_v3 = vpop.f32.mrb[17].mxu1  ;;  %v2061_v4 = vsel %vm815_vm4, %v1826_v2, -inf }
 0x51f   : > { %2062 = vmax.xlane.f32.xlu1 %v2061_v4 }
 0x521   : > { %v1903_v5 = vpop.f32.mrb[18].mxu1 }
 0x522   : > { %v2986_v6 = vpop.f32.mrb[19].mxu1  ;;  %v2064_v7 = vsel %vm815_vm4, %v1903_v5, -inf }
 0x523   : > { %2065 = vmax.xlane.f32.xlu0 %v2064_v7 }
 0x525   : > { %v1980_v8 = vpop.f32.mrb[20].mxu1 }
 0x526   : > { %v2991_v9 = vpop.f32.mrb[21].mxu1  ;;  %v2067_v10 = vsel %vm815_vm4, %v1980_v8, -inf }
 0x527   : > { %2068 = vmax.xlane.f32.xlu1 %v2067_v10 }
 0x529   : > { %v2057_v11 = vpop.f32.mrb[22].mxu1 }
 0x52a   : > { %v2996_v12 = vpop.f32.mrb[23].mxu1  ;;  %v2070_v13 = vsel %vm815_vm4, %v2057_v11, -inf }
 0x52b   : > { %2071 = vmax.xlane.f32.xlu0 %v2070_v13 }
 0x538   : > { %2251 = vrot.lane.b32.xlu1 %v3371_v58, %s3188_s27  ;;  %v2098_v58 = vpop.permute.xlu1 %2097 }
 0x53c   : > { %2328 = vrot.lane.b32.xlu1 %v3369_v57, %s3188_s27 }
 0x541   : > { %2174 = vrot.lane.b32.xlu0 %v3367_v55, %s3188_s27 }
 0x5ac   : > { %v2063_v21 = vpop.xlane.xlu1 %2062 }
 0x5ad   : > { %v2073_v22 = vsub.f32 %v1826_v2, %v2063_v21 }
 0x5af   : > { %v2077_v24 = vmul.f32 1.442695, %v2073_v22 }
 0x5b0   : > { %v2066_v25 = vpop.xlane.xlu0 %2065 }
 0x5b1   : > { %3115 = vpow2.f32 %v2077_v24  ;;  %v2074_v26 = vsub.f32 %v1903_v5, %v2066_v25 }
 0x5b3   : > { %v2079_v28 = vmul.f32 1.442695, %v2074_v26 }
 0x5b4   : > { %v2069_v29 = vpop.xlane.xlu1 %2068 }
 0x5b5   : > { %3117 = vpow2.f32 %v2079_v28  ;;  %v2075_v57 = vsub.f32 %v1980_v8, %v2069_v29 }
 0x5b7   : > { %v2081_v30 = vmul.f32 1.442695, %v2075_v57 }
 0x5b8   : > { %v2072_v31 = vpop.xlane.xlu0 %2071  ;;  %v2252_v40 = vpop.permute.xlu1 %2251 }
 0x5b9   : > { %3119 = vpow2.f32 %v2081_v30  ;;  %v2076_v32 = vsub.f32 %v2057_v11, %v2072_v31 }
 0x5bb   : > { %v3116_v33 = vpop.eup %3115  ;;  %v2083_v34 = vmul.f32 1.442695, %v2076_v32 }
 0x5bc   : > { %2998 = vmatpush3.xpose.msk.msra.mxu0 %vm815_vm4, %v3116_v33  ;;  %v2085_v55 = vsel %vm815_vm4, %v3116_v33, 0.0  ;;  %v2175_v37 = vpop.permute.xlu0 %2174  ;;  %v2329_v44 = vpop.permute.xlu1 %2328 }
 0x5bd   : > { %3121 = vpow2.f32 %v2083_v34  ;;  %2086 = vadd.xlane.f32.xlu0 %v2085_v55  ;;  %3007 = vmatprep.subr.mxu0 %v3186_v27 }
 0x5bf   : > { %v3118_v35 = vpop.eup %3117  ;;  %3000 = vmatmul.mubr.msk.f32.vlgmr.msra.gmra.mrb[16].mxu0 %vm815_vm4, %v2098_v58 }
 0x5c0   : > { %3003 = vmatpush3.xpose.msk.msra.mxu1 %vm815_vm4, %v3118_v35  ;;  %v2088_v36 = vsel %vm815_vm4, %v3118_v35, 0.0  ;;  %3009 = vmatprep.mubr.msk.f32.mxu0 %vm3187_vm3, %v3186_v27 }
 0x5c1   : > { %2089 = vadd.xlane.f32.xlu1 %v2088_v36  ;;  %3012 = vmatprep.subr.mxu1 %v3186_v27 }
 0x5c3   : > { %v3120_v38 = vpop.eup %3119  ;;  %3005 = vmatmul.mubr.msk.f32.vlgmr.msra.gmra.mrb[24].mxu1 %vm815_vm4, %v2175_v37 }
 0x5c4   : > { %3008 = vmatpush3.xpose.msk.msra.mxu0 %vm815_vm4, %v3120_v38  ;;  %v2091_v41 = vsel %vm815_vm4, %v3120_v38, 0.0  ;;  %3014 = vmatprep.mubr.msk.f32.mxu1 %vm3187_vm3, %v3186_v27  ;;  %v686_v27 = vld [vmem:[%s3273_s19 + $0x18] sm:$0xff] }
 0x5c5   : > { %2092 = vadd.xlane.f32.xlu0 %v2091_v41 }
 0x5c7   : > { %v3122_v42 = vpop.eup %3121  ;;  %3010 = vmatmul.mubr.msk.f32.vlgmr.msra.gmra.mrb[18].mxu0 %vm815_vm4, %v2252_v40 }
 0x5c8   : > { %3013 = vmatpush3.xpose.msk.msra.mxu1 %vm815_vm4, %v3122_v42  ;;  %v2094_v43 = vsel %vm815_vm4, %v3122_v42, 0.0  ;;  %3025 = vmatprep.mubr.msk.f32.mxu0 %vm517_vm2, %v679_v14 }
 0x5c9   : > { %2095 = vadd.xlane.f32.xlu0 %v2094_v43 }
 0x5cb   : > { %3015 = vmatmul.mubr.msk.f32.vlgmr.msra.gmra.mrb[26].mxu1 %vm815_vm4, %v2329_v44 }
 0x5d2   : > { %2572 = vperm.xlu1 %3096, %v683_v45  }
 0x5d6   : > { %2582 = vperm.xlu1 %3096, %v685_v46  }
 0x5da   : > { %2587 = vperm.xlu1 %3096, %v686_v27  }
 0x5df   : > { %2577 = vperm.xlu0 %3095, %v684_v47  }
 0x5e4   : > { %v2973_v48 = vpop.f32.mrb[12].mxu0 }
 0x5e5   : > { %v1590_v49 = vpop.f32.mrb[13].mxu0 }
 0x5e8   : > { %v2976_v50 = vpop.f32.mrb[14].mxu0 }
 0x5e9   : > { %v3478_v51 = vpop.f32.mrb[15].mxu0 }
 0x64a   : > { %v2087_v52 = vpop.xlane.xlu0 %2086 }
 0x64b   : > { %3123 = vrcp.f32 %v2087_v52 }
 0x64e   : > { %v2090_v53 = vpop.xlane.xlu1 %2089 }
 0x64f   : > { %3125 = vrcp.f32 %v2090_v53 }
 0x652   : > { %v2093_v54 = vpop.xlane.xlu0 %2092 }
 0x653   : > { %3127 = vrcp.f32 %v2093_v54 }
 0x655   : > { %v3124_v59 = vpop.eup %3123 }
 0x656   : > { %v2096_v56 = vpop.xlane.xlu0 %2095  ;;  %v2416_v63 = vrot.slane %v3124_v59, %v3419_v39 }
 0x657   : > { %3129 = vrcp.f32 %v2096_v56 }
 0x659   : > { %v3126_v60 = vpop.eup %3125 }
 0x65a   : > { %v2420_v0 = vrot.slane %v3126_v60, %v3419_v39 }
 0x65d   : > { %v3128_v5 = vpop.eup %3127 }
 0x65e   : > { %v2424_v10 = vrot.slane %v3128_v5, %v3419_v39 }
 0x661   : > { %v3130_v7 = vpop.eup %3129 }
 0x662   : > { %v2428_v11 = vrot.slane %v3130_v7, %v3419_v39 }
 0x692   : > { %v2170_v61 = vpop.f32.mrb[16].mxu0 }
 0x693   : > { %v3001_v62 = vpop.f32.mrb[17].mxu0  ;;  %v2457_v2 = vmul.f32 %v2416_v63, %v2170_v61 }
 0x696   : > { %v2247_v1 = vpop.f32.mrb[24].mxu1 }
 0x697   : > { %v2458_v3 = vmul.f32 %v2420_v0, %v2247_v1  ;;  %v3006_v4 = vpop.f32.mrb[25].mxu1 }
 0x699   : > { %v3047_v6 = vpack.c.bf16 %v2458_v3, %v2457_v2 }
 0x69a   : > { %v2324_v8 = vpop.f32.mrb[18].mxu0 }
 0x69b   : > { %v3011_v9 = vpop.f32.mrb[19].mxu0  ;;  %3048 = vmatprep.subr.bf16.mxu0 %v3047_v6  ;;  %v2459_v13 = vmul.f32 %v2424_v10, %v2324_v8 }
 0x69c   : > { %3050 = vmatpush3.bf16.msra.mxu0 %v3047_v6 }
 0x69e   : > { %v2401_v12 = vpop.f32.mrb[26].mxu1 }
 0x69f   : > { %v2460_v14 = vmul.f32 %v2428_v11, %v2401_v12  ;;  %v3016_v58 = vpop.f32.mrb[27].mxu1 }
 0x6a1   : > { %v3051_v21 = vpack.c.bf16 %v2460_v14, %v2459_v13 }
 0x6a3   : > { %3052 = vmatprep.subr.bf16.mxu0 %v3051_v21 }
 0x6a4   : > { %3054 = vmatpush3.bf16.msra.mxu0 %v3051_v21 }
 0x6a7   : > { %3026 = vmatmul.mubr.msk.f32.vlgmr.msra.gmra.mrb[20].mxu0 %vm517_vm2, %v3433_v17  ;;  %v2573_v17 = vpop.permute.xlu1 %2572 }
 0x6a8   : > { %3028 = vmatprep.mubr.msk.f32.mxu0 %vm517_vm2, %v3440_v18  ;;  %v2578_v18 = vpop.permute.xlu0 %2577 }
 0x6ab   : > { %3029 = vmatmul.mubr.msk.f32.gmra.mrb[22].mxu0 %vm517_vm2, %v3445_v20  ;;  %v2583_v26 = vpop.permute.xlu1 %2582 }
 0x6af   : > { %v2588_v28 = vpop.permute.xlu1 %2587 }
 0x77a   : > { %v3027_v22 = vpop.f32.mrb[20].mxu0 }
 0x77b   : > { %2552 = vrot.lane.b32.xlu1 %v3027_v22, %s3189_s30  ;;  %v2527_v39 = vpop.f32.mrb[21].mxu0 }
 0x77c   : > { %2550 = vrot.lane.b32.xlu0 %v2527_v39, %s3189_s30 }
 0x77e   : > { %v3030_v24 = vpop.f32.mrb[22].mxu0 }
 0x77f   : > { %2556 = vrot.lane.b32.xlu1 %v3030_v24, %s3189_s30  ;;  %v2537_v25 = vpop.f32.mrb[23].mxu0 }
 0x780   : > { %2554 = vrot.lane.b32.xlu0 %v2537_v25, %s3189_s30 }
 0x7ed   : > { %v2553_v29 = vpop.permute.xlu1 %2552 }
 0x7ee   : > { %v2563_v20 = vsel %vm815_vm4, %v2973_v48, %v2553_v29  ;;  %v2551_v57 = vpop.permute.xlu0 %2550 }
 0x7ef   : > { %v2567_v30 = vadd.f32 %v2563_v20, %v3292_v16  ;;  %v2562_v31 = vsel %vm815_vm4, %v1590_v49, %v2551_v57 }
 0x7f0   : > { %v2566_v32 = vadd.f32 %v2562_v31, %v3290_v15 }
 0x7f1   : > { %v2591_v33 = vadd.f32 %v2578_v18, %v2567_v30  ;;  %v2557_v34 = vpop.permute.xlu1 %2556 }
 0x7f2   : > { %v2590_v55 = vadd.f32 %v2573_v17, %v2566_v32  ;;  %v2565_v35 = vsel %vm815_vm4, %v2976_v50, %v2557_v34  ;;  %v2555_v36 = vpop.permute.xlu0 %2554  ;;  %2601 = sbr.rel (%p2824_p6) target bundleno = 2178 (0x882), region = 52 }
 0x7f3   : > { %2595 = vst.msk [vmem:[#allocation2 + $0x8] sm:$0xff] %vm405_vm1, %v2591_v33  ;;  %v2569_v37 = vadd.f32 %v2565_v35, %v3304_v23  ;;  %v2564_v38 = vsel %vm815_vm4, %v3478_v51, %v2555_v36 }
 0x7f4   : > { %2594 = vst.msk [vmem:[#allocation2] sm:$0xff] %vm405_vm1, %v2590_v55  ;;  %v2568_v16 = vadd.f32 %v2564_v38, %v3298_v19 }
 0x7f5   : > { %v2593_v40 = vadd.f32 %v2588_v28, %v2569_v37 }
 0x7f6   : > { %v2592_v41 = vadd.f32 %v2583_v26, %v2568_v16 }
 0x7f7   : > { %2597 = vst.msk [vmem:[#allocation2 + $0x18] sm:$0xff] %vm405_vm1, %v2593_v40 }
 0x7f8   : > { %2596 = vst.msk [vmem:[#allocation2 + $0x10] sm:$0xff] %vm405_vm1, %v2592_v41 }
 0x7fa   : > { %v2603_v42 = vld [vmem:[#allocation2 + $0x8] sm:$0xff] }
 0x7fb   : > { %v2602_v15 = vld [vmem:[#allocation2] sm:$0xff] }
 0x7fc   : > { %2606 = vxpose.xlu0.b32.start [1/4] (short) (narrow) %v2602_v15, 16 }
 0x7fe   : > { %v2605_v43 = vld [vmem:[#allocation2 + $0x18] sm:$0xff] }
 0x7ff   : > { %v2604_v23 = vld [vmem:[#allocation2 + $0x10] sm:$0xff] }
 0x800   : > { %2607 = vxpose.xlu0.b32.cont [2/4] (short) (narrow) %v2603_v42, 16 }
 0x804   : > { %2608 = vxpose.xlu0.b32.cont [3/4] (short) (narrow) %v2604_v23, 16 }
 0x808   : > { %2609 = vxpose.xlu0.b32.end [4/4] (short) (narrow) %v2605_v43, 16 }
 0x87c   : > { %v2622_v44 = vpop.trf.xlu0 }
 0x87d   : > { %2638 = vst.msk [vmem:[#allocation3] sm:$0xff] %vm517_vm2, %v2622_v44 }
 0x880   : > { %v2623_v19 = vpop.trf.xlu0 }
 0x881   : > { %2639 = vst.msk [vmem:[#allocation3 + $0x8] sm:$0xff] %vm517_vm2, %v2623_v19 }
 0x882 PF: > { %p3512_p7 = scmp.eq.s32.totalorder %s2765_s24, 1  ;;  %s3190_s7 = smov [#allocation3]  }
 0x883   : > { %s2649_s8 = sshll.u32 %s3190_s7, 4  ;;  %s2650_s8 = int_to_ptr.vmem [resolvable:$true] %s2649_s8 }
 0x884   : > { %s3131_s9 = scalar_lea.vmem %s2650_s8, 256  ;;  %p3138_p11 = scmp.lt.s32.totalorder %s2650_s8, %s2650_s8 }
 0x885   : > { %p3132_p8 = scmp.ne.s32.totalorder %s2650_s8, %s3131_s9  ;;  %p3139_p12 = scmp.lt.s32.totalorder %s3131_s9, %s3131_s9 }
 0x887   : > { %p3133_p9 = pnand %p3132_p8, %p3512_p7  ;;  %p3140_p13 = por %p3139_p12, %p3138_p11 }
 0x889   : > { %p3134_p10 = pneg %p3133_p9 }
 0x88b   : > { %p3141_p0 = pnand %p3140_p13, %p3134_p10 }
 0x88d   : > { %3144 = shalt.err (!%p3141_p0)
}
 0x88e   : > { %s3145_s24 = scalar_lea.hbm %s3554_s6, 256 }
 0x88f   : > { %p3146_p1 = scmp.ne.s32.totalorder %s3554_s6, %s3145_s24  ;;  %p3151_p4 = scmp.lt.u32.totalorder %s3145_s24, %s3554_s6 }
 0x891   : > { %p3147_p2 = pnand %p3146_p1, %p3512_p7 }
 0x893   : > { %p3148_p3 = pneg %p3147_p2 }
 0x895   : > { %p3153_p5 = pnand %p3151_p4, %p3148_p3 }
 0x897   : > { %3156 = shalt.err (!%p3153_p5)
}
 0x898   : > { %s3191_s16 = smov 128  }
 0x899   : > { %3057 = dma.vmem_to_hbm [thread:$0]  (%p3512_p7), %s2650_s8, 256, %s3554_s6, [#allocation4], %s3191_s16, %s3191_s16, %s3189_s30  }
 0x89a   : > { %3170 = dma.done.wait (%p3512_p7), [#allocation4], 256  }
 0x89b   : > { %3172 = vsyncadd (%p3512_p7), [#allocation4], 4294967040 }
 0x89c PF: > { %s17_s23 = sadd.s32 1, %s3183_s23   ;;  %s3556_s21 = smov %s3179_s22 }
 0x89d   : > { %p14_p6 = scmp.ge.s32.totalorder %s17_s23, 4   ;;  %s3557_s22 = smov %s3559_s25 }
 0x89f   :  { %16 = sbr.rel (!%p14_p6) target bundleno = 2 (0x2), region = 95 }
 0x8a6   :  { %2665 = vsyncpa [#allocation4], 1 }
 0x8a7   :  { %2667 = vsyncpa [#allocation4 + $0x1], 1 }

</bundles_post_ra>
